<compile_context>
chip_gen: v7x
topology: tpu7x:2x2x1
jax: 0.10.0
libtpu: 0.0.40
codegen_flags: <defaults>
</compile_context>

<pallas_src>
import jax
import jax.numpy as jnp
from jax.experimental import pallas as pl
from jax.experimental.pallas import tpu as pltpu

LANE = 128   # lane-dense padded feature width
HID = 32     # lattice / nodenum head hidden width


# ---------------------------------------------------------------------------
# Kernels
# ---------------------------------------------------------------------------
def _global_heads_kernel(latent_ref, sem_ref,
                         wln1_ref, bln1_ref, wln2_ref, bln2_ref,
                         ws1_ref, bs1_ref, ws2_ref, bs2_ref,
                         latnode_ref, ypred_ref):
    # Fused (splitGlobal ∘ {decoderLattice, decoderNodenum}):
    #   hidden lanes 0:32  = lattice branch, lanes 32:64 = nodenum branch,
    #   output lanes 0:6   = lattice_out,    lanes 6:106 = node_num_logit.
    h_ln = jnp.maximum(
        jnp.dot(latent_ref[...], wln1_ref[...],
                preferred_element_type=jnp.float32) + bln1_ref[...], 0.0)
    latnode_ref[...] = (jnp.dot(h_ln, wln2_ref[...],
                                preferred_element_type=jnp.float32)
                        + bln2_ref[...]).astype(latnode_ref.dtype)

    # proj_out_semantic_pred: Linear(128->64) -> ReLU -> Linear(64->12), padded.
    h_s = jnp.maximum(
        jnp.dot(sem_ref[...], ws1_ref[...],
                preferred_element_type=jnp.float32) + bs1_ref[...], 0.0)
    ypred_ref[...] = (jnp.dot(h_s, ws2_ref[...],
                              preferred_element_type=jnp.float32)
                      + bs2_ref[...]).astype(ypred_ref.dtype)


def _proj_pos_kernel(x_ref, w1_ref, b1_ref, w2_ref, b2_ref, o_ref):
    # proj_out_pos: Linear(128->64) -> ReLU -> Linear(64->3), lane-padded.
    h = jnp.maximum(
        jnp.dot(x_ref[...], w1_ref[...],
                preferred_element_type=jnp.float32) + b1_ref[...], 0.0)
    o_ref[...] = (jnp.dot(h, w2_ref[...], preferred_element_type=jnp.float32)
                  + b2_ref[...]).astype(o_ref.dtype)


# ---------------------------------------------------------------------------
# One-time weight preparation (hoisted out of the per-call hot path)
# ---------------------------------------------------------------------------
def prepare_geom_decoder_params(raw, latent_dim=128, max_node_num=100):
    """Transpose torch-layout [out,in] weights to [in,out], zero-pad every
    feature axis to 128 lanes, fuse the lattice/nodenum heads into one
    128-lane MLP, and fold splitGlobal into its first layer. Done once."""
    half = latent_dim // 2
    assert 6 + max_node_num <= LANE

    def place(w_t, rows, row_off=0, col_off=0):
        out = jnp.zeros((rows, LANE), jnp.float32)
        return out.at[row_off:row_off + w_t.shape[0],
                      col_off:col_off + w_t.shape[1]].set(w_t.astype(jnp.float32))

    def place_b(b, col_off=0):
        out = jnp.zeros((1, LANE), jnp.float32)
        return out.at[0, col_off:col_off + b.shape[0]].set(b.astype(jnp.float32))

    p = {}

    # --- Fused lattice + nodenum head operating on lat2 = splitGlobal(latent).
    # First layer on lat2: lattice uses rows [half:], nodenum uses rows [:half].
    w_h_lat2 = jnp.zeros((latent_dim, LANE), jnp.float32)
    w_h_lat2 = w_h_lat2.at[half:, 0:HID].set(raw["wl1"].T.astype(jnp.float32))
    w_h_lat2 = w_h_lat2.at[:half, HID:2 * HID].set(raw["wn1"].T.astype(jnp.float32))
    b_h = jnp.zeros((1, LANE), jnp.float32)
    b_h = b_h.at[0, 0:HID].set(raw["bl1"].astype(jnp.float32))
    b_h = b_h.at[0, HID:2 * HID].set(raw["bn1"].astype(jnp.float32))

    # Fold splitGlobal (Linear 128->128) into the fused first layer:
    #   lat2 = latent @ Wsg^T + bsg
    #   lat2 @ Wh + bh = latent @ (Wsg^T @ Wh) + (bsg @ Wh + bh)
    wsg_t = raw["wsg"].T.astype(jnp.float32)
    bsg = raw["bsg"].astype(jnp.float32)
    p["wln1"] = wsg_t @ w_h_lat2
    p["bln1"] = b_h + bsg[None, :] @ w_h_lat2

    # Second layer: lattice_out -> lanes [0:6], node_num_logit -> lanes [6:106].
    w2 = jnp.zeros((LANE, LANE), jnp.float32)
    w2 = w2.at[0:HID, 0:6].set(raw["wl2"].T.astype(jnp.float32))
    w2 = w2.at[HID:2 * HID, 6:6 + max_node_num].set(raw["wn2"].T.astype(jnp.float32))
    b2 = jnp.zeros((1, LANE), jnp.float32)
    b2 = b2.at[0, 0:6].set(raw["bl2"].astype(jnp.float32))
    b2 = b2.at[0, 6:6 + max_node_num].set(raw["bn2"].astype(jnp.float32))
    p["wln2"], p["bln2"] = w2, b2

    # --- proj_out_semantic_pred (128 -> 64 -> 12)
    p["ws1"] = place(raw["ws1"].T, latent_dim)
    p["bs1"] = place_b(raw["bs1"])
    p["ws2"] = place(raw["ws2"].T, LANE)
    p["bs2"] = place_b(raw["bs2"])

    # --- proj_out_pos (128 -> 64 -> 3)
    p["wp1"] = place(raw["wp1"].T, latent_dim)
    p["bp1"] = place_b(raw["bp1"])
    p["wp2"] = place(raw["wp2"].T, LANE)
    p["bp2"] = place_b(raw["bp2"])
    return p


# ---------------------------------------------------------------------------
# Forward wrappers
# ---------------------------------------------------------------------------
def _proj_out_pos(node_emb, p, tile_n=128):
    """Per-node coordinate head, gridded over node tiles with resident weights."""
    n, d = node_emb.shape
    n_tiles = (n + tile_n - 1) // tile_n
    n_pad = n_tiles * tile_n
    x = node_emb if n_pad == n else jnp.pad(node_emb, ((0, n_pad - n), (0, 0)))

    flops = 2 * n_pad * LANE * (d + LANE)
    bytes_acc = 4 * (n_pad * d + 2 * (d * LANE + LANE) + n_pad * LANE)

    out = pl.pallas_call(
        _proj_pos_kernel,
        out_shape=jax.ShapeDtypeStruct((n_pad, LANE), jnp.float32),
        grid_spec=pltpu.PrefetchScalarGridSpec(
            num_scalar_prefetch=0,
            grid=(n_tiles,),
            in_specs=[
                pl.BlockSpec((tile_n, d), lambda i: (i, 0)),
                pl.BlockSpec((d, LANE), lambda i: (0, 0)),
                pl.BlockSpec((1, LANE), lambda i: (0, 0)),
                pl.BlockSpec((LANE, LANE), lambda i: (0, 0)),
                pl.BlockSpec((1, LANE), lambda i: (0, 0)),
            ],
            out_specs=pl.BlockSpec((tile_n, LANE), lambda i: (i, 0)),
        ),
        compiler_params=pltpu.CompilerParams(
            dimension_semantics=("parallel",)),
        cost_estimate=pl.CostEstimate(flops=flops, transcendentals=0,
                                      bytes_accessed=bytes_acc),
    )(x, p["wp1"], p["bp1"], p["wp2"], p["bp2"])
    return out[:n, :3]


def geom_decoder_dense_forward(latent, semantic_emb, node_emb, p,
                               max_node_num=100, condition_dim=12):
    """Dense hot path of GeomDecoder.forward (is_condition=False).
    TODO(synk): shared_decoder / GPSModel / EdgeDecoderDotProduct and the
    ragged repeat_interleave are graph-structured upstream/downstream stages
    and are not part of this Pallas path."""
    b, d = latent.shape
    vmem = pl.BlockSpec(memory_space=pltpu.MemorySpace.VMEM)

    flops_a = 2 * b * LANE * (d + LANE) * 2          # 4 fused matmuls
    bytes_a = 4 * (2 * b * d + 4 * (d * LANE + LANE) + 2 * b * LANE)

    latnode_pad, ypred_pad = pl.pallas_call(
        _global_heads_kernel,
        out_shape=(jax.ShapeDtypeStruct((b, LANE), jnp.float32),
                   jax.ShapeDtypeStruct((b, LANE), jnp.float32)),
        in_specs=[vmem] * 10,
        out_specs=(vmem, vmem),
        cost_estimate=pl.CostEstimate(flops=flops_a, transcendentals=0,
                                      bytes_accessed=bytes_a),
    )(latent, semantic_emb,
      p["wln1"], p["bln1"], p["wln2"], p["bln2"],
      p["ws1"], p["bs1"], p["ws2"], p["bs2"])

    # Narrow slices taken OUTSIDE the kernel (lane-dense stores inside).
    lengths_pred = latnode_pad[:, :3]
    angles_pred = latnode_pad[:, 3:6]
    node_num_logit = latnode_pad[:, 6:6 + max_node_num]
    node_num_prob = jax.nn.softmax(node_num_logit, axis=-1)
    node_num_pred = jnp.argmax(node_num_prob, axis=-1) + 1
    y_pred = ypred_pad[:, :condition_dim]

    coords_pred = _proj_out_pos(node_emb, p)

    return (node_num_logit, node_num_pred, lengths_pred, angles_pred,
            coords_pred, y_pred)


# ---------------------------------------------------------------------------
# Reference + init helpers
# ---------------------------------------------------------------------------
def _torch_linear_init(key, out_features, in_features):
    """Deterministic stand-in for nn.Linear default init."""
    kw, kb = jax.random.split(key)
    bound = 1.0 / jnp.sqrt(jnp.float32(in_features))
    w = jax.random.uniform(kw, (out_features, in_features), jnp.float32,
                           -bound, bound)
    b = jax.random.uniform(kb, (out_features,), jnp.float32, -bound, bound)
    return w, b


def reference_forward(latent, semantic_emb, node_emb, raw, half=64):
    lat2 = latent @ raw["wsg"].T + raw["bsg"]
    graph_latent, lattice_latent = lat2[:, :half], lat2[:, half:]
    lattice_out = (jnp.maximum(lattice_latent @ raw["wl1"].T + raw["bl1"], 0.0)
                   @ raw["wl2"].T + raw["bl2"])
    lengths_pred = lattice_out[:, :3]
    angles_pred = lattice_out[:, 3:]
    node_num_logit = (jnp.maximum(graph_latent @ raw["wn1"].T + raw["bn1"], 0.0)
                      @ raw["wn2"].T + raw["bn2"])
    node_num_pred = jnp.argmax(jax.nn.softmax(node_num_logit, -1), -1) + 1
    y_pred = (jnp.maximum(semantic_emb @ raw["ws1"].T + raw["bs1"], 0.0)
              @ raw["ws2"].T + raw["bs2"])
    coords_pred = (jnp.maximum(node_emb @ raw["wp1"].T + raw["bp1"], 0.0)
                   @ raw["wp2"].T + raw["bp2"])
    return (node_num_logit, node_num_pred, lengths_pred, angles_pred,
            coords_pred, y_pred)


if __name__ == "__main__":
    latent_dim = 128
    max_node_num = 100
    condition_dim = 12
    B = 8  # graphs per batch

    key = jax.random.PRNGKey(0)
    keys = jax.random.split(key, 10)

    # Raw torch-layout parameters of the dense submodules.
    raw = {}
    raw["wsg"], raw["bsg"] = _torch_linear_init(keys[0], latent_dim, latent_dim)
    raw["wl1"], raw["bl1"] = _torch_linear_init(keys[1], 32, latent_dim // 2)
    raw["wl2"], raw["bl2"] = _torch_linear_init(keys[2], 6, 32)
    raw["wn1"], raw["bn1"] = _torch_linear_init(keys[3], 32, latent_dim // 2)
    raw["wn2"], raw["bn2"] = _torch_linear_init(keys[4], max_node_num, 32)
    raw["ws1"], raw["bs1"] = _torch_linear_init(keys[5], latent_dim // 2, latent_dim)
    raw["ws2"], raw["bs2"] = _torch_linear_init(keys[6], condition_dim, latent_dim // 2)
    raw["wp1"], raw["bp1"] = _torch_linear_init(keys[7], 64, latent_dim)
    raw["wp2"], raw["bp2"] = _torch_linear_init(keys[8], 3, 64)

    # One-time prep (transpose + lane padding + splitGlobal fold) off the hot path.
    prepared = prepare_geom_decoder_params(raw, latent_dim, max_node_num)

    # Inputs the (external) encoder / shared_decoder / GPSModel would produce.
    k_lat, k_sem, k_node = jax.random.split(keys[9], 3)
    latent = jax.random.normal(k_lat, (B, latent_dim), jnp.float32)
    semantic_emb = jax.random.normal(k_sem, (B, latent_dim), jnp.float32)
    num_nodes = jnp.array([5, 3, 7, 4, 6, 2, 5, 4], jnp.int32)
    n_total = int(num_nodes.sum())
    node_emb = jax.random.normal(k_node, (n_total, latent_dim), jnp.float32)

    outs = geom_decoder_dense_forward(latent, semantic_emb, node_emb, prepared,
                                      max_node_num=max_node_num,
                                      condition_dim=condition_dim)
    outs = jax.block_until_ready(outs)
    refs = reference_forward(latent, semantic_emb, node_emb, raw,
                             half=latent_dim // 2)

    names = ["node_num_logit", "node_num_pred", "lengths_pred", "angles_pred",
             "coords_pred", "y_pred"]
    for name, got, ref in zip(names, outs, refs):
        assert got.shape == ref.shape, f"{name}: shape {got.shape} vs {ref.shape}"
        if name == "node_num_pred":
            assert jnp.all(got == ref), f"{name} mismatch"
        else:
            assert jnp.allclose(got, ref, atol=2e-4, rtol=2e-4), f"{name} mismatch"

    print("KERNEL_OK")
</pallas_src>

<mosaic_0001>
module attributes {stable_mosaic.version = 11 : i64} {
  func.func @_global_heads_kernel(%arg0: memref<8x128xf32, #tpu.memory_space<vmem>>, %arg1: memref<8x128xf32, #tpu.memory_space<vmem>>, %arg2: memref<128x128xf32, #tpu.memory_space<vmem>>, %arg3: memref<1x128xf32, #tpu.memory_space<vmem>>, %arg4: memref<128x128xf32, #tpu.memory_space<vmem>>, %arg5: memref<1x128xf32, #tpu.memory_space<vmem>>, %arg6: memref<128x128xf32, #tpu.memory_space<vmem>>, %arg7: memref<1x128xf32, #tpu.memory_space<vmem>>, %arg8: memref<128x128xf32, #tpu.memory_space<vmem>>, %arg9: memref<1x128xf32, #tpu.memory_space<vmem>>, %arg10: memref<8x128xf32, #tpu.memory_space<vmem>>, %arg11: memref<8x128xf32, #tpu.memory_space<vmem>>) attributes {dimension_semantics = [], scalar_prefetch = 0 : i64, scratch_operands = 0 : i64, tpu.core_type = #tpu.core_type<tc>} {
    %c0 = arith.constant 0 : index
    %c0_0 = arith.constant 0 : index
    %0 = vector.load %arg0[%c0, %c0_0] : memref<8x128xf32, #tpu.memory_space<vmem>>, vector<8x128xf32>
    %c0_1 = arith.constant 0 : index
    %c0_2 = arith.constant 0 : index
    %1 = vector.load %arg2[%c0_1, %c0_2] : memref<128x128xf32, #tpu.memory_space<vmem>>, vector<128x128xf32>
    %cst = arith.constant dense<0.000000e+00> : vector<8x128xf32>
    %2 = tpu.matmul %0, %1, %cst {dimension_numbers = #tpu.dot_dimension_numbers<[1], [0], [0], [1], [0, 0, 1, 1], [], []>} : vector<8x128xf32>, vector<128x128xf32>, vector<8x128xf32> -> vector<8x128xf32>
    %c0_3 = arith.constant 0 : index
    %c0_4 = arith.constant 0 : index
    %3 = vector.load %arg3[%c0_3, %c0_4] : memref<1x128xf32, #tpu.memory_space<vmem>>, vector<1x128xf32>
    %4 = vector.broadcast %3 : vector<1x128xf32> to vector<8x128xf32>
    %5 = arith.addf %2, %4 : vector<8x128xf32>
    %cst_5 = arith.constant 0.000000e+00 : f32
    %6 = vector.broadcast %cst_5 : f32 to vector<8x128xf32>
    %7 = arith.maximumf %5, %6 : vector<8x128xf32>
    %c0_6 = arith.constant 0 : index
    %c0_7 = arith.constant 0 : index
    %8 = vector.load %arg4[%c0_6, %c0_7] : memref<128x128xf32, #tpu.memory_space<vmem>>, vector<128x128xf32>
    %cst_8 = arith.constant dense<0.000000e+00> : vector<8x128xf32>
    %9 = tpu.matmul %7, %8, %cst_8 {dimension_numbers = #tpu.dot_dimension_numbers<[1], [0], [0], [1], [0, 0, 1, 1], [], []>} : vector<8x128xf32>, vector<128x128xf32>, vector<8x128xf32> -> vector<8x128xf32>
    %c0_9 = arith.constant 0 : index
    %c0_10 = arith.constant 0 : index
    %10 = vector.load %arg5[%c0_9, %c0_10] : memref<1x128xf32, #tpu.memory_space<vmem>>, vector<1x128xf32>
    %11 = vector.broadcast %10 : vector<1x128xf32> to vector<8x128xf32>
    %12 = arith.addf %9, %11 : vector<8x128xf32>
    %c0_11 = arith.constant 0 : index
    %c0_12 = arith.constant 0 : index
    %13 = vector.load %arg10[%c0_11, %c0_12] : memref<8x128xf32, #tpu.memory_space<vmem>>, vector<8x128xf32>
    tpu.vector_store %arg10[%c0_11, %c0_12], %12 {strides = array<i32>} : memref<8x128xf32, #tpu.memory_space<vmem>>, vector<8x128xf32>,
    %c0_13 = arith.constant 0 : index
    %c0_14 = arith.constant 0 : index
    %14 = vector.load %arg1[%c0_13, %c0_14] : memref<8x128xf32, #tpu.memory_space<vmem>>, vector<8x128xf32>
    %c0_15 = arith.constant 0 : index
    %c0_16 = arith.constant 0 : index
    %15 = vector.load %arg6[%c0_15, %c0_16] : memref<128x128xf32, #tpu.memory_space<vmem>>, vector<128x128xf32>
    %cst_17 = arith.constant dense<0.000000e+00> : vector<8x128xf32>
    %16 = tpu.matmul %14, %15, %cst_17 {dimension_numbers = #tpu.dot_dimension_numbers<[1], [0], [0], [1], [0, 0, 1, 1], [], []>} : vector<8x128xf32>, vector<128x128xf32>, vector<8x128xf32> -> vector<8x128xf32>
    %c0_18 = arith.constant 0 : index
    %c0_19 = arith.constant 0 : index
    %17 = vector.load %arg7[%c0_18, %c0_19] : memref<1x128xf32, #tpu.memory_space<vmem>>, vector<1x128xf32>
    %18 = vector.broadcast %17 : vector<1x128xf32> to vector<8x128xf32>
    %19 = arith.addf %16, %18 : vector<8x128xf32>
    %cst_20 = arith.constant 0.000000e+00 : f32
    %20 = vector.broadcast %cst_20 : f32 to vector<8x128xf32>
    %21 = arith.maximumf %19, %20 : vector<8x128xf32>
    %c0_21 = arith.constant 0 : index
    %c0_22 = arith.constant 0 : index
    %22 = vector.load %arg8[%c0_21, %c0_22] : memref<128x128xf32, #tpu.memory_space<vmem>>, vector<128x128xf32>
    %cst_23 = arith.constant dense<0.000000e+00> : vector<8x128xf32>
    %23 = tpu.matmul %21, %22, %cst_23 {dimension_numbers = #tpu.dot_dimension_numbers<[1], [0], [0], [1], [0, 0, 1, 1], [], []>} : vector<8x128xf32>, vector<128x128xf32>, vector<8x128xf32> -> vector<8x128xf32>
    %c0_24 = arith.constant 0 : index
    %c0_25 = arith.constant 0 : index
    %24 = vector.load %arg9[%c0_24, %c0_25] : memref<1x128xf32, #tpu.memory_space<vmem>>, vector<1x128xf32>
    %25 = vector.broadcast %24 : vector<1x128xf32> to vector<8x128xf32>
    %26 = arith.addf %23, %25 : vector<8x128xf32>
    %c0_26 = arith.constant 0 : index
    %c0_27 = arith.constant 0 : index
    %27 = vector.load %arg11[%c0_26, %c0_27] : memref<8x128xf32, #tpu.memory_space<vmem>>, vector<8x128xf32>
    tpu.vector_store %arg11[%c0_26, %c0_27], %26 {strides = array<i32>} : memref<8x128xf32, #tpu.memory_space<vmem>>, vector<8x128xf32>,
    return
  }
}

</mosaic_0001>

<bundles_post_ra>
// kernel: tpu_custom_call.1
= control target key start
LH: loop header
LB: loop body
LE: loop exit
PB: predicated region body
PF: predicated region fallthrough
CT: control target
= control target key end

     0   :  { %17 = vsyncpa [#allocation3], 0  ;;  %s1269_s0 = inlined_call_operand.hbm [shape: f32[8,128], index: 0, kind: input, shape index: {}]   ;;  %s1270_s1 = inlined_call_operand.hbm [shape: f32[8,128], index: 1, kind: input, shape index: {}]   ;;  %s1271_s2 = inlined_call_operand.hbm [shape: f32[128,128], index: 2, kind: input, shape index: {}]   ;;  %s1272_s3 = inlined_call_operand.vmem [shape: f32[1,128], index: 3, kind: input, shape index: {}]   ;;  %s1273_s4 = inlined_call_operand.hbm [shape: f32[128,128], index: 4, kind: input, shape index: {}]   ;;  %s1274_s5 = inlined_call_operand.vmem [shape: f32[1,128], index: 5, kind: input, shape index: {}]   ;;  %s1275_s6 = inlined_call_operand.hbm [shape: f32[128,128], index: 6, kind: input, shape index: {}]   ;;  %s1276_s7 = inlined_call_operand.vmem [shape: f32[1,128], index: 7, kind: input, shape index: {}]   ;;  %s1277_s8 = inlined_call_operand.hbm [shape: f32[128,128], index: 8, kind: input, shape index: {}]   ;;  %s1278_s9 = inlined_call_operand.vmem [shape: f32[1,128], index: 9, kind: input, shape index: {}]   ;;  %s1279_s10 = inlined_call_operand.hbm [shape: f32[8,128], index: 10, kind: output, shape index: {0}]   ;;  %s1280_s11 = inlined_call_operand.hbm [shape: f32[8,128], index: 11, kind: output, shape index: {1}]  }
   0x1   :  { %18 = vsyncpa [#allocation6], 0 }
   0x2   :  { %19 = vsyncpa [#allocation9], 0 }
   0x3   :  { %20 = vsyncpa [#allocation12], 0 }
   0x4   :  { %21 = vsyncpa [#allocation4], 0 }
   0x5   :  { %22 = vsyncpa [#allocation15], 0  ;;  %s1036_s17 = smov [#allocation5]   ;;  %s848_s21 = scalar_lea.hbm %s1270_s1, 128 }
   0x6   :  { %s39_s18 = sshll.u32 %s1036_s17, 4  ;;  %p849_p0 = scmp.ne.s32.totalorder %s1270_s1, %s848_s21  ;;  %s40_s18 = int_to_ptr.vmem [resolvable:$true] %s39_s18 }
   0x7   :  { %p852_p1 = scmp.lt.u32.totalorder %s848_s21, %s1270_s1 }
   0x9   :  { %p854_p2 = pnand %p852_p1, %p849_p0 }
   0xb   :  { %857 = shalt.err (!%p854_p2)
}
   0xc   :  { %s858_s26 = scalar_lea.vmem %s40_s18, 128  ;;  %p863_p4 = scmp.lt.s32.totalorder %s40_s18, %s40_s18 }
   0xd   :  { %p859_p3 = scmp.ne.s32.totalorder %s40_s18, %s858_s26  ;;  %p864_p5 = scmp.lt.s32.totalorder %s858_s26, %s858_s26 }
   0xf   :  { %p865_p6 = por %p864_p5, %p863_p4 }
  0x11   :  { %p866_p7 = pnand %p865_p6, %p859_p3 }
  0x13   :  { %869 = shalt.err (!%p866_p7)
}
  0x14   :  { %42 = dma.hbm_to_vmem [thread:$0]  %s1270_s1, 128, %s40_s18, [#allocation6]  }
  0x15   :  { %s1037_s29 = smov [#allocation8]   ;;  %s1038_s12 = smov [#allocation2]  }
  0x16   :  { %s62_s30 = sshll.u32 %s1037_s29, 4  ;;  %s29_s13 = sshll.u32 %s1038_s12, 4  ;;  %s63_s30 = int_to_ptr.vmem [resolvable:$true] %s62_s30  ;;  %s30_s13 = int_to_ptr.vmem [resolvable:$true] %s29_s13 }
  0x17   :  { %s870_s16 = scalar_lea.hbm %s1273_s4, 2048 }
  0x18   :  { %p871_p8 = scmp.ne.s32.totalorder %s1273_s4, %s870_s16  ;;  %p874_p9 = scmp.lt.u32.totalorder %s870_s16, %s1273_s4 }
  0x1a   :  { %p876_p10 = pnand %p874_p9, %p871_p8 }
  0x1c   :  { %879 = shalt.err (!%p876_p10)
}
  0x1d   :  { %s880_s1 = scalar_lea.vmem %s63_s30, 2048  ;;  %p885_p12 = scmp.lt.s32.totalorder %s63_s30, %s63_s30 }
  0x1e   :  { %p881_p11 = scmp.ne.s32.totalorder %s63_s30, %s880_s1  ;;  %p886_p13 = scmp.lt.s32.totalorder %s880_s1, %s880_s1 }
  0x20   :  { %p887_p0 = por %p886_p13, %p885_p12 }
  0x22   :  { %p888_p1 = pnand %p887_p0, %p881_p11 }
  0x24   :  { %891 = shalt.err (!%p888_p1)
}
  0x25   :  { %s1039_s18 = smov 128   ;;  %s1040_s22 = smov 8  }
  0x26   :  { %68 = dma.hbm_to_vmem [thread:$0]  %s1273_s4, 2048, %s63_s30, [#allocation9], %s1039_s18, %s1039_s18, %s1040_s22  }
  0x27   :  { %s892_s27 = scalar_lea.hbm %s1269_s0, 128 }
  0x28   :  { %p893_p2 = scmp.ne.s32.totalorder %s1269_s0, %s892_s27  ;;  %p896_p3 = scmp.lt.u32.totalorder %s892_s27, %s1269_s0 }
  0x2a   :  { %p898_p4 = pnand %p896_p3, %p893_p2 }
  0x2c   :  { %901 = shalt.err (!%p898_p4)
}
  0x2d   :  { %s902_s15 = scalar_lea.vmem %s30_s13, 128  ;;  %p907_p6 = scmp.lt.s32.totalorder %s30_s13, %s30_s13 }
  0x2e   :  { %p903_p5 = scmp.ne.s32.totalorder %s30_s13, %s902_s15  ;;  %p908_p7 = scmp.lt.s32.totalorder %s902_s15, %s902_s15 }
  0x30   :  { %p909_p8 = por %p908_p7, %p907_p6 }
  0x32   :  { %p910_p9 = pnand %p909_p8, %p903_p5 }
  0x34   :  { %913 = shalt.err (!%p910_p9)
}
  0x35   :  { %32 = dma.hbm_to_vmem [thread:$0]  %s1269_s0, 128, %s30_s13, [#allocation3]  }
  0x36   :  { %s1041_s16 = smov [#allocation7]   ;;  %s1042_s19 = smov [#allocation10]  }
  0x37   :  { %s48_s17 = sshll.u32 %s1041_s16, 4  ;;  %s76_s20 = sshll.u32 %s1042_s19, 4  ;;  %s49_s17 = int_to_ptr.vmem [resolvable:$true] %s48_s17  ;;  %s77_s20 = int_to_ptr.vmem [resolvable:$true] %s76_s20 }
  0x38   :  { %s914_s23 = scalar_lea.hbm %s1271_s2, 2048 }
  0x39   :  { %p915_p10 = scmp.ne.s32.totalorder %s1271_s2, %s914_s23  ;;  %p918_p11 = scmp.lt.u32.totalorder %s914_s23, %s1271_s2 }
  0x3b   :  { %p920_p12 = pnand %p918_p11, %p915_p10 }
  0x3d   :  { %923 = shalt.err (!%p920_p12)
}
  0x3e   :  { %s924_s0 = scalar_lea.vmem %s49_s17, 2048  ;;  %p929_p0 = scmp.lt.s32.totalorder %s49_s17, %s49_s17 }
  0x3f   :  { %p925_p13 = scmp.ne.s32.totalorder %s49_s17, %s924_s0  ;;  %p930_p1 = scmp.lt.s32.totalorder %s924_s0, %s924_s0 }
  0x41   :  { %p931_p2 = por %p930_p1, %p929_p0 }
  0x43   :  { %p932_p3 = pnand %p931_p2, %p925_p13 }
  0x45   :  { %935 = shalt.err (!%p932_p3)
}
  0x46   :  { %54 = dma.hbm_to_vmem [thread:$0]  %s1271_s2, 2048, %s49_s17, [#allocation6], %s1039_s18, %s1039_s18, %s1040_s22  }
  0x47   :  { %s936_s14 = scalar_lea.hbm %s1275_s6, 2048 }
  0x48   :  { %p937_p4 = scmp.ne.s32.totalorder %s1275_s6, %s936_s14  ;;  %p940_p5 = scmp.lt.u32.totalorder %s936_s14, %s1275_s6 }
  0x4a   :  { %p942_p6 = pnand %p940_p5, %p937_p4 }
  0x4c   :  { %945 = shalt.err (!%p942_p6)
}
  0x4d   :  { %s946_s19 = scalar_lea.vmem %s77_s20, 2048  ;;  %p951_p8 = scmp.lt.s32.totalorder %s77_s20, %s77_s20 }
  0x4e   :  { %p947_p7 = scmp.ne.s32.totalorder %s77_s20, %s946_s19  ;;  %p952_p9 = scmp.lt.s32.totalorder %s946_s19, %s946_s19 }
  0x50   :  { %p953_p10 = por %p952_p9, %p951_p8 }
  0x52   :  { %p954_p11 = pnand %p953_p10, %p947_p7 }
  0x54   :  { %957 = shalt.err (!%p954_p11)
}
  0x55   :  { %82 = dma.hbm_to_vmem [thread:$0]  %s1275_s6, 2048, %s77_s20, [#allocation9], %s1039_s18, %s1039_s18, %s1040_s22  }
  0x56   :  { %s1043_s21 = smov [#allocation11]   ;;  %s958_s25 = scalar_lea.hbm %s1277_s8, 2048 }
  0x57   :  { %s90_s1 = sshll.u32 %s1043_s21, 4  ;;  %p959_p12 = scmp.ne.s32.totalorder %s1277_s8, %s958_s25  ;;  %s91_s1 = int_to_ptr.vmem [resolvable:$true] %s90_s1 }
  0x58   :  { %p962_p13 = scmp.lt.u32.totalorder %s958_s25, %s1277_s8 }
  0x5a   :  { %p964_p0 = pnand %p962_p13, %p959_p12 }
  0x5c   :  { %967 = shalt.err (!%p964_p0)
}
  0x5d   :  { %s968_s28 = scalar_lea.vmem %s91_s1, 2048  ;;  %p973_p2 = scmp.lt.s32.totalorder %s91_s1, %s91_s1 }
  0x5e   :  { %p969_p1 = scmp.ne.s32.totalorder %s91_s1, %s968_s28  ;;  %p974_p3 = scmp.lt.s32.totalorder %s968_s28, %s968_s28 }
  0x60   :  { %p975_p4 = por %p974_p3, %p973_p2 }
  0x62   :  { %p976_p5 = pnand %p975_p4, %p969_p1 }
  0x64   :  { %979 = shalt.err (!%p976_p5)
}
  0x65   :  { %96 = dma.hbm_to_vmem [thread:$0]  %s1277_s8, 2048, %s91_s1, [#allocation12], %s1039_s18, %s1039_s18, %s1040_s22  }
  0x66   :  { %1024 = dma.done.wait [#allocation3], 128  }
  0x67   :  { %1025 = vsyncadd [#allocation3], 4294967168 }
  0x68   :  { %1026 = dma.done.wait [#allocation6], 2176  }
  0x69   :  { %1027 = vsyncadd [#allocation6], 4294965120 }
  0x6a   :  { %1028 = dma.done.wait [#allocation9], 4096  }
  0x6b   :  { %1029 = vsyncadd [#allocation9], 4294963200 }
  0x6c   :  { %1030 = dma.done.wait [#allocation12], 2048  }
  0x6d   :  { %1031 = vsyncadd [#allocation12], 4294965248  ;;  %v1044_v0 = vmov 0.0|0.0   ;;  %vm1045_vm0 = vmmov 0   ;;  %v1046_v1 = vmov 0.0   ;;  %v118_v2 = vld [vmem:[#allocation7] sm:$0xff] }
  0x6e   :  { %739 = vmatprep.subr.bf16.mxu0 %v1044_v0  ;;  %631 = vmatprep.mubr.msk.f32.mxu0 %vm1045_vm0, %v1046_v1  ;;  %v119_v3 = vld [vmem:[#allocation7 + $0x8] sm:$0xff]  ;;  %v120_v4 = vld [vmem:[#allocation7 + $0x10] sm:$0xff]  ;;  %v121_v6 = vld [vmem:[#allocation7 + $0x18] sm:$0xff]  ;;  %s1047_s14 = smov [#allocation13]  }
  0x6f   :  { %763 = vmatprep.subr.bf16.mxu1 %v1044_v0  ;;  %666 = vmatprep.mubr.msk.f32.mxu1 %vm1045_vm0, %v1046_v1  ;;  %v740_v5 = vpack.c.bf16 %v119_v3, %v118_v2  ;;  %v743_v7 = vpack.c.bf16 %v121_v6, %v120_v4  ;;  %v122_v8 = vld [vmem:[#allocation7 + $0x20] sm:$0xff]  ;;  %v123_v9 = vld [vmem:[#allocation7 + $0x28] sm:$0xff]  ;;  %v124_v11 = vld [vmem:[#allocation7 + $0x30] sm:$0xff]  ;;  %s501_s15 = sshll.u32 %s1047_s14, 4  ;;  %s502_s15 = int_to_ptr.vmem [resolvable:$true] %s501_s15 }
  0x70   :  { %v746_v10 = vpack.c.bf16 %v123_v9, %v122_v8  ;;  %v125_v12 = vld [vmem:[#allocation7 + $0x38] sm:$0xff]  ;;  %v126_v14 = vld [vmem:[#allocation7 + $0x40] sm:$0xff]  ;;  %v213_v16 = vld [vmem:[#allocation8 + $0x8] sm:$0xff]  ;;  %p985_p7 = scmp.lt.s32.totalorder %s502_s15, %s502_s15 }
  0x71   :  { %741 = vmatpush3.bf16.msra.mxu0 %v740_v5  ;;  %v749_v13 = vpack.c.bf16 %v125_v12, %v124_v11  ;;  %v212_v15 = vld [vmem:[#allocation8] sm:$0xff]  ;;  %v127_v17 = vld [vmem:[#allocation7 + $0x48] sm:$0xff]  ;;  %v214_v19 = vld [vmem:[#allocation8 + $0x10] sm:$0xff] }
  0x72   :  { %742 = vmatprep.subr.bf16.mxu0 %v1044_v0  ;;  %v764_v18 = vpack.c.bf16 %v213_v16, %v212_v15  ;;  %v215_v20 = vld [vmem:[#allocation8 + $0x18] sm:$0xff]  ;;  %v752_v22 = vpack.c.bf16 %v127_v17, %v126_v14  ;;  %v216_v23 = vld [vmem:[#allocation8 + $0x20] sm:$0xff]  ;;  %v217_v24 = vld [vmem:[#allocation8 + $0x28] sm:$0xff] }
  0x73   :  { %v767_v21 = vpack.c.bf16 %v215_v20, %v214_v19  ;;  %v128_v25 = vld [vmem:[#allocation7 + $0x50] sm:$0xff]  ;;  %v129_v26 = vld [vmem:[#allocation7 + $0x58] sm:$0xff]  ;;  %v770_v27 = vpack.c.bf16 %v217_v24, %v216_v23  ;;  %v130_v31 = vld [vmem:[#allocation7 + $0x60] sm:$0xff] }
  0x74   :  { %765 = vmatpush3.bf16.msra.mxu1 %v764_v18  ;;  %v755_v28 = vpack.c.bf16 %v129_v26, %v128_v25  ;;  %v218_v29 = vld [vmem:[#allocation8 + $0x30] sm:$0xff]  ;;  %v219_v30 = vld [vmem:[#allocation8 + $0x38] sm:$0xff]  ;;  %v131_v32 = vld [vmem:[#allocation7 + $0x68] sm:$0xff] }
  0x75   :  { %744 = vmatpush3.bf16.msra.mxu0 %v743_v7  ;;  %766 = vmatprep.subr.bf16.mxu1 %v1044_v0  ;;  %v773_v33 = vpack.c.bf16 %v219_v30, %v218_v29  ;;  %v758_v34 = vpack.c.bf16 %v131_v32, %v130_v31  ;;  %v220_v35 = vld [vmem:[#allocation8 + $0x40] sm:$0xff]  ;;  %v221_v36 = vld [vmem:[#allocation8 + $0x48] sm:$0xff]  ;;  %v132_v37 = vld [vmem:[#allocation7 + $0x70] sm:$0xff] }
  0x76   :  { %745 = vmatprep.subr.bf16.mxu0 %v1044_v0  ;;  %v133_v38 = vld [vmem:[#allocation7 + $0x78] sm:$0xff]  ;;  %v776_v39 = vpack.c.bf16 %v221_v36, %v220_v35  ;;  %v222_v41 = vld [vmem:[#allocation8 + $0x50] sm:$0xff]  ;;  %v307_v43 = vld [vmem:[#allocation10] sm:$0xff] }
  0x77   :  { %v761_v40 = vpack.c.bf16 %v133_v38, %v132_v37  ;;  %v223_v42 = vld [vmem:[#allocation8 + $0x58] sm:$0xff]  ;;  %v308_v44 = vld [vmem:[#allocation10 + $0x8] sm:$0xff]  ;;  %v117_v46 = vld [vmem:[#allocation2] sm:$0xff] }
  0x78   :  { %768 = vmatpush3.bf16.msra.mxu1 %v767_v21  ;;  %v779_v45 = vpack.c.bf16 %v223_v42, %v222_v41  ;;  %v788_v47 = vpack.c.bf16 %v308_v44, %v307_v43  ;;  %v224_v48 = vld [vmem:[#allocation8 + $0x60] sm:$0xff]  ;;  %v225_v49 = vld [vmem:[#allocation8 + $0x68] sm:$0xff]  ;;  %v309_v50 = vld [vmem:[#allocation10 + $0x10] sm:$0xff] }
  0x79   :  { %747 = vmatpush3.bf16.msra.mxu0 %v746_v10  ;;  %769 = vmatprep.subr.bf16.mxu1 %v1044_v0  ;;  %v310_v51 = vld [vmem:[#allocation10 + $0x18] sm:$0xff]  ;;  %v782_v52 = vpack.c.bf16 %v225_v49, %v224_v48  ;;  %v311_v54 = vld [vmem:[#allocation10 + $0x20] sm:$0xff]  ;;  %v312_v55 = vld [vmem:[#allocation10 + $0x28] sm:$0xff] }
  0x7a   :  { %748 = vmatprep.subr.bf16.mxu0 %v1044_v0  ;;  %v791_v53 = vpack.c.bf16 %v310_v51, %v309_v50  ;;  %v794_v56 = vpack.c.bf16 %v312_v55, %v311_v54  ;;  %v313_v57 = vld [vmem:[#allocation10 + $0x30] sm:$0xff]  ;;  %v314_v58 = vld [vmem:[#allocation10 + $0x38] sm:$0xff]  ;;  %v315_v60 = vld [vmem:[#allocation10 + $0x40] sm:$0xff] }
  0x7b   :  { %v797_v59 = vpack.c.bf16 %v314_v58, %v313_v57  ;;  %v316_v61 = vld [vmem:[#allocation10 + $0x48] sm:$0xff]  ;;  %v317_v63 = vld [vmem:[#allocation10 + $0x50] sm:$0xff]  ;;  %v318_v2 = vld [vmem:[#allocation10 + $0x58] sm:$0xff] }
  0x7c   :  { %771 = vmatpush3.bf16.msra.mxu1 %v770_v27  ;;  %v800_v62 = vpack.c.bf16 %v316_v61, %v315_v60  ;;  %v803_v3 = vpack.c.bf16 %v318_v2, %v317_v63  ;;  %v319_v4 = vld [vmem:[#allocation10 + $0x60] sm:$0xff]  ;;  %v320_v5 = vld [vmem:[#allocation10 + $0x68] sm:$0xff]  ;;  %v321_v7 = vld [vmem:[#allocation10 + $0x70] sm:$0xff] }
  0x7d   :  { %750 = vmatpush3.bf16.msra.mxu0 %v749_v13  ;;  %772 = vmatprep.subr.bf16.mxu1 %v1044_v0  ;;  %v806_v6 = vpack.c.bf16 %v320_v5, %v319_v4  ;;  %v322_v8 = vld [vmem:[#allocation10 + $0x78] sm:$0xff]  ;;  %v226_v11 = vld [vmem:[#allocation8 + $0x70] sm:$0xff]  ;;  %v401_v15 = vld [vmem:[#allocation11] sm:$0xff] }
  0x7e   :  { %751 = vmatprep.subr.bf16.mxu0 %v1044_v0  ;;  %v809_v9 = vpack.c.bf16 %v322_v8, %v321_v7  ;;  %v306_v10 = vld [vmem:[#allocation5] sm:$0xff]  ;;  %v527_v14 = vld [vmem:[%s1272_s3] ss:$0 sm:$0xff]  ;;  %v402_v16 = vld [vmem:[#allocation11 + $0x8] sm:$0xff] }
  0x7f   :  { %v227_v12 = vld [vmem:[#allocation8 + $0x78] sm:$0xff]  ;;  %v812_v20 = vpack.c.bf16 %v402_v16, %v401_v15  ;;  %v405_v25 = vld [vmem:[#allocation11 + $0x20] sm:$0xff]  ;;  %v406_v26 = vld [vmem:[#allocation11 + $0x28] sm:$0xff] }
  0x80   :  { %774 = vmatpush3.bf16.msra.mxu1 %v773_v33  ;;  %v785_v13 = vpack.c.bf16 %v227_v12, %v226_v11  ;;  %v404_v23 = vld [vmem:[#allocation11 + $0x18] sm:$0xff]  ;;  %v818_v27 = vpack.c.bf16 %v406_v26, %v405_v25  ;;  %v409_v31 = vld [vmem:[#allocation11 + $0x40] sm:$0xff]  ;;  %v410_v32 = vld [vmem:[#allocation11 + $0x48] sm:$0xff] }
  0x81   :  { %753 = vmatpush3.bf16.msra.mxu0 %v752_v22  ;;  %775 = vmatprep.subr.bf16.mxu1 %v1044_v0  ;;  %v403_v22 = vld [vmem:[#allocation11 + $0x10] sm:$0xff]  ;;  %v408_v29 = vld [vmem:[#allocation11 + $0x38] sm:$0xff]  ;;  %v824_v33 = vpack.c.bf16 %v410_v32, %v409_v31  ;;  %v413_v36 = vld [vmem:[#allocation11 + $0x60] sm:$0xff] }
  0x82   :  { %754 = vmatprep.subr.bf16.mxu0 %v1044_v0  ;;  %v815_v24 = vpack.c.bf16 %v404_v23, %v403_v22  ;;  %v414_v37 = vld [vmem:[#allocation11 + $0x68] sm:$0xff]  ;;  %v529_v41 = vld [vmem:[%s1276_s7] ss:$0 sm:$0xff]  ;;  %s980_s7 = scalar_lea.vmem %s502_s15, 128 }
  0x83   :  { %v830_v38 = vpack.c.bf16 %v414_v37, %v413_v36  ;;  %p981_p6 = scmp.ne.s32.totalorder %s502_s15, %s980_s7  ;;  %p986_p8 = scmp.lt.s32.totalorder %s980_s7, %s980_s7 }
  0x84   :  { %777 = vmatpush3.bf16.msra.mxu1 %v776_v39  ;;  %v415_v39 = vld [vmem:[#allocation11 + $0x70] sm:$0xff] }
  0x85   :  { %756 = vmatpush3.bf16.msra.mxu0 %v755_v28  ;;  %778 = vmatprep.subr.bf16.mxu1 %v1044_v0  ;;  %v407_v28 = vld [vmem:[#allocation11 + $0x30] sm:$0xff]  ;;  %p987_p9 = por %p986_p8, %p985_p7 }
  0x86   :  { %757 = vmatprep.subr.bf16.mxu0 %v1044_v0  ;;  %v821_v30 = vpack.c.bf16 %v408_v29, %v407_v28 }
  0x87   :  { %p988_p10 = pnand %p987_p9, %p981_p6 }
  0x88   :  { %780 = vmatpush3.bf16.msra.mxu1 %v779_v45 }
  0x89   :  { %759 = vmatpush3.bf16.msra.mxu0 %v758_v34  ;;  %781 = vmatprep.subr.bf16.mxu1 %v1044_v0  ;;  %v412_v34 = vld [vmem:[#allocation11 + $0x58] sm:$0xff] }
  0x8a   :  { %760 = vmatprep.subr.bf16.mxu0 %v1044_v0 }
  0x8c   :  { %783 = vmatpush3.bf16.msra.mxu1 %v782_v52 }
  0x8d   :  { %762 = vmatpush3.bf16.msra.mxu0 %v761_v40  ;;  %784 = vmatprep.subr.bf16.mxu1 %v1044_v0  ;;  %v416_v40 = vld [vmem:[#allocation11 + $0x78] sm:$0xff] }
  0x8e   :  { %787 = vmatprep.subr.bf16.mxu0 %v1044_v0  ;;  %v833_v42 = vpack.c.bf16 %v416_v40, %v415_v39 }
  0x90   :  { %632 = vmatmul.mubr.f32.vlgmr.msra.gmra.mrb[0].mxu0 %v117_v46  ;;  %786 = vmatpush3.bf16.msra.mxu1 %v785_v13 }
  0x91   :  { %789 = vmatpush3.bf16.msra.mxu0 %v788_v47  ;;  %701 = vmatprep.mubr.msk.f32.mxu0 %vm1045_vm0, %v1046_v1  ;;  %v528_v47 = vld [vmem:[%s1274_s5] ss:$0 sm:$0xff] }
  0x92   :  { %790 = vmatprep.subr.bf16.mxu0 %v1044_v0  ;;  %811 = vmatprep.subr.bf16.mxu1 %v1044_v0 }
  0x95   :  { %792 = vmatpush3.bf16.msra.mxu0 %v791_v53 }
  0x96   :  { %793 = vmatprep.subr.bf16.mxu0 %v1044_v0 }
  0x99   :  { %795 = vmatpush3.bf16.msra.mxu0 %v794_v56 }
  0x9a   :  { %796 = vmatprep.subr.bf16.mxu0 %v1044_v0 }
  0x9d   :  { %798 = vmatpush3.bf16.msra.mxu0 %v797_v59 }
  0x9e   :  { %799 = vmatprep.subr.bf16.mxu0 %v1044_v0 }
  0xa1   :  { %801 = vmatpush3.bf16.msra.mxu0 %v800_v62 }
  0xa2   :  { %802 = vmatprep.subr.bf16.mxu0 %v1044_v0 }
  0xa5   :  { %804 = vmatpush3.bf16.msra.mxu0 %v803_v3 }
  0xa6   :  { %805 = vmatprep.subr.bf16.mxu0 %v1044_v0 }
  0xa9   :  { %807 = vmatpush3.bf16.msra.mxu0 %v806_v6 }
  0xaa   :  { %808 = vmatprep.subr.bf16.mxu0 %v1044_v0 }
  0xad   :  { %810 = vmatpush3.bf16.msra.mxu0 %v809_v9 }
  0xb0   :  { %702 = vmatmul.mubr.f32.vlgmr.msra.gmra.mrb[2].mxu0 %v306_v10 }
 0x163   :  { %v207_v17 = vpop.f32.mrb[0].mxu0 }
 0x164   :  { %v208_v18 = vadd.f32 %v527_v14, %v207_v17  ;;  %v633_v19 = vpop.f32.mrb[1].mxu0 }
 0x166   :  { %v211_v21 = vmax.f32 %v208_v18, 0.0 }
 0x168   :  { %667 = vmatmul.mubr.f32.vlgmr.msra.gmra.mrb[0].mxu1 %v211_v21 }
 0x169   :  { %813 = vmatpush3.bf16.msra.mxu1 %v812_v20  ;;  %736 = vmatprep.mubr.msk.f32.mxu1 %vm1045_vm0, %v1046_v1  ;;  %v411_v1 = vld [vmem:[#allocation11 + $0x50] sm:$0xff] }
 0x16a   :  { %814 = vmatprep.subr.bf16.mxu1 %v1044_v0  ;;  %v827_v35 = vpack.c.bf16 %v412_v34, %v411_v1 }
 0x16d   :  { %816 = vmatpush3.bf16.msra.mxu1 %v815_v24 }
 0x16e   :  { %817 = vmatprep.subr.bf16.mxu1 %v1044_v0 }
 0x171   :  { %819 = vmatpush3.bf16.msra.mxu1 %v818_v27 }
 0x172   :  { %820 = vmatprep.subr.bf16.mxu1 %v1044_v0 }
 0x175   :  { %822 = vmatpush3.bf16.msra.mxu1 %v821_v30 }
 0x176   :  { %823 = vmatprep.subr.bf16.mxu1 %v1044_v0 }
 0x179   :  { %825 = vmatpush3.bf16.msra.mxu1 %v824_v33 }
 0x17a   :  { %826 = vmatprep.subr.bf16.mxu1 %v1044_v0 }
 0x17d   :  { %828 = vmatpush3.bf16.msra.mxu1 %v827_v35 }
 0x17e   :  { %829 = vmatprep.subr.bf16.mxu1 %v1044_v0 }
 0x181   :  { %831 = vmatpush3.bf16.msra.mxu1 %v830_v38 }
 0x182   :  { %832 = vmatprep.subr.bf16.mxu1 %v1044_v0 }
 0x183   :  { %v396_v43 = vpop.f32.mrb[2].mxu0 }
 0x184   :  { %v397_v44 = vadd.f32 %v529_v41, %v396_v43  ;;  %v703_v45 = vpop.f32.mrb[3].mxu0 }
 0x185   :  { %834 = vmatpush3.bf16.msra.mxu1 %v833_v42 }
 0x186   :  { %v400_v46 = vmax.f32 %v397_v44, 0.0 }
 0x188   :  { %737 = vmatmul.mubr.f32.vlgmr.msra.gmra.mrb[2].mxu1 %v400_v46 }
 0x23b   :  { %v301_v48 = vpop.f32.mrb[0].mxu1 }
 0x23c   :  { %v302_v49 = vadd.f32 %v528_v47, %v301_v48  ;;  %v668_v50 = vpop.f32.mrb[1].mxu1 }
 0x23e   :  { %305 = vst [vmem:[#allocation13] sm:$0xff] %v302_v49 }
 0x23f   :  { %991 = shalt.err (!%p988_p10)
}
 0x240   :  { %s992_s16 = scalar_lea.hbm %s1279_s10, 128 }
 0x241   :  { %p993_p11 = scmp.ne.s32.totalorder %s1279_s10, %s992_s16  ;;  %p996_p12 = scmp.lt.u32.totalorder %s992_s16, %s1279_s10 }
 0x243   :  { %p998_p13 = pnand %p996_p12, %p993_p11 }
 0x245   :  { %1001 = shalt.err (!%p998_p13)
}
 0x246   :  { %504 = dma.vmem_to_hbm [thread:$0]  %s502_s15, 128, %s1279_s10, [#allocation4]   ;;  %v530_v0 = vld [vmem:[%s1278_s9] ss:$0 sm:$0xff] }
 0x247   :  { %s1048_s25 = smov [#allocation14]  }
 0x248   :  { %s511_s26 = sshll.u32 %s1048_s25, 4  ;;  %s512_s26 = int_to_ptr.vmem [resolvable:$true] %s511_s26 }
 0x249   :  { %s1002_s27 = scalar_lea.vmem %s512_s26, 128  ;;  %p1007_p1 = scmp.lt.s32.totalorder %s512_s26, %s512_s26 }
 0x24a   :  { %p1003_p0 = scmp.ne.s32.totalorder %s512_s26, %s1002_s27  ;;  %p1008_p2 = scmp.lt.s32.totalorder %s1002_s27, %s1002_s27 }
 0x24c   :  { %p1009_p3 = por %p1008_p2, %p1007_p1 }
 0x24e   :  { %p1010_p4 = pnand %p1009_p3, %p1003_p0 }
 0x25b   :  { %v490_v51 = vpop.f32.mrb[2].mxu1 }
 0x25c   :  { %v491_v52 = vadd.f32 %v530_v0, %v490_v51  ;;  %v738_v53 = vpop.f32.mrb[3].mxu1 }
 0x25e   :  { %494 = vst [vmem:[#allocation14] sm:$0xff] %v491_v52 }
 0x25f   :  { %1013 = shalt.err (!%p1010_p4)
}
 0x260   :  { %s1014_s13 = scalar_lea.hbm %s1280_s11, 128 }
 0x261   :  { %p1015_p5 = scmp.ne.s32.totalorder %s1280_s11, %s1014_s13  ;;  %p1018_p6 = scmp.lt.u32.totalorder %s1014_s13, %s1280_s11 }
 0x263   :  { %p1020_p7 = pnand %p1018_p6, %p1015_p5 }
 0x265   :  { %1023 = shalt.err (!%p1020_p7)
}
 0x266   :  { %514 = dma.vmem_to_hbm [thread:$0]  %s512_s26, 128, %s1280_s11, [#allocation15]  }
 0x267   :  { %1032 = dma.done.wait [#allocation4], 128  }
 0x268   :  { %1033 = vsyncadd [#allocation4], 4294967168 }
 0x269   :  { %1034 = dma.done.wait [#allocation15], 128  }
 0x26a   :  { %1035 = vsyncadd [#allocation15], 4294967168 }
 0x26b   :  { %521 = vsyncpa [#allocation3], 1 }
 0x26c   :  { %522 = vsyncpa [#allocation6], 1 }
 0x26d   :  { %523 = vsyncpa [#allocation9], 1 }
 0x26e   :  { %524 = vsyncpa [#allocation12], 1 }
 0x26f   :  { %525 = vsyncpa [#allocation4], 1 }
 0x270   :  { %526 = vsyncpa [#allocation15], 1 }

</bundles_post_ra>
